<compile_context>
chip_gen: v7x
topology: tpu7x:2x2x1
jax: 0.10.0
libtpu: 0.0.40
codegen_flags: <defaults>
</compile_context>

<pallas_src>
import math

import jax
import jax.numpy as jnp
from jax.experimental import pallas as pl
from jax.experimental.pallas import tpu as pltpu

_EPS = 1e-05
_LANES = 128
_SUBLANES = 8
_MAX_BLOCK_ROWS = 2048  # (2048, 128) f32 block = 1 MiB; 3 in x 2 buf = 6 MiB VMEM


def _make_kernel(block_rows, rows_per_split, needs_mask):
    def kernel(x_ref, t_ref, m_ref, out_ref, acc_ref):
        i = pl.program_id(1)

        # Zero the vector accumulator at the start of each split.
        @pl.when(i == 0)
        def _():
            acc_ref[...] = jnp.zeros_like(acc_ref)

        x = x_ref[...].astype(jnp.float32)
        t = t_ref[...].astype(jnp.float32)
        m = m_ref[...].astype(jnp.float32)

        s = jax.nn.sigmoid(x)
        part1 = t * jnp.log(s + _EPS)
        part2 = (1.0 - t) * jnp.log(1.0 - s + _EPS)
        contrib = m * (part1 + part2)

        if needs_mask:
            # Boundary block of this split may read garbage rows past the
            # array extent; zero their contribution (covers garbage mask too).
            row = jax.lax.broadcasted_iota(jnp.int32, (block_rows, _LANES), 0)
            valid = (i * block_rows + row) < rows_per_split
            contrib = jnp.where(valid, contrib, 0.0)

        # Fold (block_rows, 128) -> (8, 128) on the VPU (tile-aligned reshape,
        # sum over whole vregs) and accumulate.  No per-step XLU reduce.
        acc_ref[...] += contrib.reshape(
            block_rows // _SUBLANES, _SUBLANES, _LANES
        ).sum(axis=0)

        # Single output write per split.
        @pl.when(i == pl.num_programs(1) - 1)
        def _():
            out_ref[...] = acc_ref[...]

    return kernel


def masked_bce(inputs, targets, mask):
    """-sum(mask * (t*log(sigmoid(x)+eps) + (1-t)*log(1-sigmoid(x)+eps)))."""
    assert inputs.shape == targets.shape == mask.shape
    total = math.prod(inputs.shape)

    # Two independent partial sums so both v7x TensorCores can stream halves.
    num_splits = 2 if total >= 2 * _SUBLANES * _LANES else 1

    # Minimal alignment so the slab reshapes to (splits, rows, 128) with
    # rows a multiple of 8.  Padded x/t are zeros; padded mask is zero, so
    # padded elements contribute nothing.
    align = num_splits * _SUBLANES * _LANES
    padded_total = ((total + align - 1) // align) * align
    pad = padded_total - total

    def _prep(a):
        flat = a.reshape(-1)  # native dtype; cast happens in-kernel
        if pad:
            flat = jnp.pad(flat, (0, pad))
        return flat.reshape(num_splits, padded_total // (num_splits * _LANES), _LANES)

    x3 = _prep(inputs)
    t3 = _prep(targets)
    m3 = _prep(mask)

    rows_per_split = x3.shape[1]
    block_rows = min(_MAX_BLOCK_ROWS, rows_per_split)
    inner_grid = pl.cdiv(rows_per_split, block_rows)
    needs_mask = (rows_per_split % block_rows) != 0

    in_spec = pl.BlockSpec((None, block_rows, _LANES), lambda c, i: (c, i, 0))
    out_spec = pl.BlockSpec((None, _SUBLANES, _LANES), lambda c, i: (c, 0, 0))

    in_bytes = sum(int(a.size) * a.dtype.itemsize for a in (x3, t3, m3))
    out_bytes = num_splits * _SUBLANES * _LANES * 4
    cost = pl.CostEstimate(
        flops=8 * total,
        transcendentals=4 * total,
        bytes_accessed=in_bytes + out_bytes,
    )

    partials = pl.pallas_call(
        _make_kernel(block_rows, rows_per_split, needs_mask),
        out_shape=jax.ShapeDtypeStruct(
            (num_splits, _SUBLANES, _LANES), jnp.float32
        ),
        grid=(num_splits, inner_grid),
        in_specs=[in_spec, in_spec, in_spec],
        out_specs=out_spec,
        scratch_shapes=[pltpu.VMEM((_SUBLANES, _LANES), jnp.float32)],
        compiler_params=pltpu.CompilerParams(
            dimension_semantics=("parallel", "arbitrary"),
        ),
        cost_estimate=cost,
    )(x3, t3, m3)

    # Tiny final reduce of (num_splits, 8, 128) partials in the wrapper.
    return -jnp.sum(partials)


def _reference(inputs, targets, mask):
    s = jax.nn.sigmoid(inputs.astype(jnp.float32))
    t = targets.astype(jnp.float32)
    part1 = t * jnp.log(s + _EPS)
    part2 = (1.0 - t) * jnp.log(1.0 - s + _EPS)
    return -jnp.sum(mask.astype(jnp.float32) * (part1 + part2))


if __name__ == "__main__":
    key = jax.random.PRNGKey(0)
    k1, k2, k3 = jax.random.split(key, 3)

    # Shapes consistent with an NCHW activation map (batch=2, channels=4, 16x16).
    shape = (2, 4, 16, 16)
    inputs = jax.random.normal(k1, shape, dtype=jnp.float32)
    targets = (jax.random.uniform(k2, shape) > 0.5).astype(jnp.float32)
    mask = (jax.random.uniform(k3, shape) > 0.3).astype(jnp.float32)

    loss = masked_bce(inputs, targets, mask)
    jax.block_until_ready(loss)

    ref = _reference(inputs, targets, mask)
    assert jnp.allclose(loss, ref, rtol=1e-5, atol=1e-4), (loss, ref)

    print("KERNEL_OK")
</pallas_src>

<mosaic_0001>
module attributes {stable_mosaic.version = 11 : i64} {
  func.func @kernel(%arg0: i32, %arg1: i32, %arg2: memref<1x8x128xf32, #tpu.memory_space<vmem>>, %arg3: memref<1x8x128xf32, #tpu.memory_space<vmem>>, %arg4: memref<1x8x128xf32, #tpu.memory_space<vmem>>, %arg5: memref<1x8x128xf32, #tpu.memory_space<vmem>>, %arg6: memref<8x128xf32, #tpu.memory_space<vmem>>) attributes {dimension_semantics = [#tpu.dimension_semantics<parallel>, #tpu.dimension_semantics<arbitrary>], iteration_bounds = array<i64: 2, 1>, scalar_prefetch = 0 : i64, scratch_operands = 1 : i64, tpu.core_type = #tpu.core_type<tc>, window_params = [{transform_indices = @transform_0, window_bounds = array<i64: 1, 8, 128>}, {transform_indices = @transform_1, window_bounds = array<i64: 1, 8, 128>}, {transform_indices = @transform_2, window_bounds = array<i64: 1, 8, 128>}, {transform_indices = @transform_3, window_bounds = array<i64: 1, 8, 128>}]} {
    %c0_i32 = arith.constant 0 : i32
    %0 = arith.cmpi eq, %arg1, %c0_i32 : i32
    %1 = arith.extui %0 : i1 to i32
    %c0_i32_0 = arith.constant 0 : i32
    %2 = arith.cmpi ne, %1, %c0_i32_0 : i32
    scf.if %2 {
      %cst_20 = arith.constant 0.000000e+00 : f32
      %36 = vector.broadcast %cst_20 : f32 to vector<8x128xf32>
      %c0_21 = arith.constant 0 : index
      %c0_22 = arith.constant 0 : index
      %37 = vector.load %arg6[%c0_21, %c0_22] : memref<8x128xf32, #tpu.memory_space<vmem>>, vector<8x128xf32>
      tpu.vector_store %arg6[%c0_21, %c0_22], %36 {strides = array<i32>} : memref<8x128xf32, #tpu.memory_space<vmem>>, vector<8x128xf32>,
    } else {
    }
    %c0 = arith.constant 0 : index
    %c0_1 = arith.constant 0 : index
    %c0_2 = arith.constant 0 : index
    %3 = vector.load %arg2[%c0, %c0_1, %c0_2] : memref<1x8x128xf32, #tpu.memory_space<vmem>>, vector<1x8x128xf32>
    %4 = vector.shape_cast %3 : vector<1x8x128xf32> to vector<8x128xf32>
    %c0_3 = arith.constant 0 : index
    %c0_4 = arith.constant 0 : index
    %c0_5 = arith.constant 0 : index
    %5 = vector.load %arg3[%c0_3, %c0_4, %c0_5] : memref<1x8x128xf32, #tpu.memory_space<vmem>>, vector<1x8x128xf32>
    %6 = vector.shape_cast %5 : vector<1x8x128xf32> to vector<8x128xf32>
    %c0_6 = arith.constant 0 : index
    %c0_7 = arith.constant 0 : index
    %c0_8 = arith.constant 0 : index
    %7 = vector.load %arg4[%c0_6, %c0_7, %c0_8] : memref<1x8x128xf32, #tpu.memory_space<vmem>>, vector<1x8x128xf32>
    %8 = vector.shape_cast %7 : vector<1x8x128xf32> to vector<8x128xf32>
    %9 = arith.negf %4 : vector<8x128xf32>
    %10 = math.exp %9 : vector<8x128xf32>
    %cst = arith.constant 1.000000e+00 : f32
    %11 = vector.broadcast %cst : f32 to vector<8x128xf32>
    %12 = arith.addf %11, %10 : vector<8x128xf32>
    %13 = arith.divf %11, %12 : vector<8x128xf32>
    %cst_9 = arith.constant 9.99999974E-6 : f32
    %14 = vector.broadcast %cst_9 : f32 to vector<8x128xf32>
    %15 = arith.addf %13, %14 : vector<8x128xf32>
    %16 = math.log %15 : vector<8x128xf32>
    %17 = arith.mulf %6, %16 : vector<8x128xf32>
    %cst_10 = arith.constant 1.000000e+00 : f32
    %18 = vector.broadcast %cst_10 : f32 to vector<8x128xf32>
    %19 = arith.subf %18, %6 : vector<8x128xf32>
    %cst_11 = arith.constant 1.000000e+00 : f32
    %20 = vector.broadcast %cst_11 : f32 to vector<8x128xf32>
    %21 = arith.subf %20, %13 : vector<8x128xf32>
    %cst_12 = arith.constant 9.99999974E-6 : f32
    %22 = vector.broadcast %cst_12 : f32 to vector<8x128xf32>
    %23 = arith.addf %21, %22 : vector<8x128xf32>
    %24 = math.log %23 : vector<8x128xf32>
    %25 = arith.mulf %19, %24 : vector<8x128xf32>
    %26 = arith.addf %17, %25 : vector<8x128xf32>
    %27 = arith.mulf %8, %26 : vector<8x128xf32>
    %c0_13 = arith.constant 0 : index
    %c0_14 = arith.constant 0 : index
    %28 = vector.load %arg6[%c0_13, %c0_14] : memref<8x128xf32, #tpu.memory_space<vmem>>, vector<8x128xf32>
    %29 = vector.shape_cast %27 : vector<8x128xf32> to vector<1x8x128xf32>
    %cst_15 = arith.constant dense<0.000000e+00> : vector<8x128xf32>
    %30 = vector.multi_reduction <add>, %29, %cst_15 [0] : vector<1x8x128xf32> to vector<8x128xf32>
    %31 = arith.addf %28, %30 : vector<8x128xf32>
    %c0_16 = arith.constant 0 : index
    %c0_17 = arith.constant 0 : index
    %32 = vector.load %arg6[%c0_16, %c0_17] : memref<8x128xf32, #tpu.memory_space<vmem>>, vector<8x128xf32>
    tpu.vector_store %arg6[%c0_16, %c0_17], %31 {strides = array<i32>} : memref<8x128xf32, #tpu.memory_space<vmem>>, vector<8x128xf32>,
    %c0_i32_18 = arith.constant 0 : i32
    %33 = arith.cmpi eq, %arg1, %c0_i32_18 : i32
    %34 = arith.extui %33 : i1 to i32
    %c0_i32_19 = arith.constant 0 : i32
    %35 = arith.cmpi ne, %34, %c0_i32_19 : i32
    scf.if %35 {
      %c0_20 = arith.constant 0 : index
      %c0_21 = arith.constant 0 : index
      %36 = vector.load %arg6[%c0_20, %c0_21] : memref<8x128xf32, #tpu.memory_space<vmem>>, vector<8x128xf32>
      %c0_22 = arith.constant 0 : index
      %c0_23 = arith.constant 0 : index
      %c0_24 = arith.constant 0 : index
      %37 = vector.load %arg5[%c0_22, %c0_23, %c0_24] : memref<1x8x128xf32, #tpu.memory_space<vmem>>, vector<1x8x128xf32>
      %38 = vector.shape_cast %37 : vector<1x8x128xf32> to vector<8x128xf32>
      %39 = vector.shape_cast %36 : vector<8x128xf32> to vector<1x8x128xf32>
      tpu.vector_store %arg5[%c0_22, %c0_23, %c0_24], %39 {strides = array<i32>} : memref<1x8x128xf32, #tpu.memory_space<vmem>>, vector<1x8x128xf32>,
    } else {
    }
    return
  }
  func.func @transform_0(%arg0: i32, %arg1: i32) -> (i32, i32, i32) {
    %c0_i32 = arith.constant 0 : i32
    %c0_i32_0 = arith.constant 0 : i32
    return %arg0, %arg1, %c0_i32 : i32, i32, i32
  }
  func.func @transform_1(%arg0: i32, %arg1: i32) -> (i32, i32, i32) {
    %c0_i32 = arith.constant 0 : i32
    %c0_i32_0 = arith.constant 0 : i32
    return %arg0, %arg1, %c0_i32 : i32, i32, i32
  }
  func.func @transform_2(%arg0: i32, %arg1: i32) -> (i32, i32, i32) {
    %c0_i32 = arith.constant 0 : i32
    %c0_i32_0 = arith.constant 0 : i32
    return %arg0, %arg1, %c0_i32 : i32, i32, i32
  }
  func.func @transform_3(%arg0: i32, %arg1: i32) -> (i32, i32, i32) {
    %c0_i32 = arith.constant 0 : i32
    %c0_i32_0 = arith.constant 0 : i32
    %c0_i32_1 = arith.constant 0 : i32
    return %arg0, %c0_i32, %c0_i32_0 : i32, i32, i32
  }
}

</mosaic_0001>

<bundles_post_ra>
// kernel: tpu_custom_call.1
= control target key start
LH: loop header
LB: loop body
LE: loop exit
PB: predicated region body
PF: predicated region fallthrough
CT: control target
= control target key end

     0   :  { %s1017_s0 = inlined_call_operand.hbm [shape: f32[2,8,128], index: 0, kind: input, shape index: {}]   ;;  %s1018_s1 = inlined_call_operand.hbm [shape: f32[2,8,128], index: 1, kind: input, shape index: {}]   ;;  %s1019_s2 = inlined_call_operand.hbm [shape: f32[2,8,128], index: 2, kind: input, shape index: {}]   ;;  %s1020_s3 = inlined_call_operand.hbm [shape: f32[2,8,128], index: 3, kind: output, shape index: {}]  }
   0x1   :  { %1026 = sst [smem:[#allocation16_spill]] %s1018_s1 }
   0x2   :  { %8 = vsyncpa [#allocation4], 0 }
   0x3   :  { %10 = vsyncpa [#allocation4 + $0x1], 0 }
   0x4   :  { %11 = vsyncpa [#allocation7], 0 }
   0x5   :  { %13 = vsyncpa [#allocation7 + $0x1], 0 }
   0x6   :  { %14 = vsyncpa [#allocation5], 0 }
   0x7   :  { %16 = vsyncpa [#allocation5 + $0x1], 0  ;;  %s753_s12 = smov 0   ;;  %s755_s13 = smov 0  }
   0x8   :  { %s757_s14 = smov 0   ;;  %s759_s15 = smov 0  }
   0x9   :  { %s761_s16 = smov 0   ;;  %s763_s17 = smov 0  }
   0xa LB: > { %1027 = sst [smem:[#allocation13_spill]] %s723_s16  ;;  %s784_s18 = sadd.s32 4294967295, %s727_s17   ;;  %s727_s17 = sphi %s763_s17, %s22_s17   ;;  %s723_s16 = sphi %s761_s16, %s1048_s16   ;;  %s719_s15 = sphi %s759_s15, %s1047_s15   ;;  %s715_s14 = sphi %s757_s14, %s1051_s14   ;;  %s711_s13 = sphi %s755_s13, %s1050_s13   ;;  %s707_s12 = sphi %s753_s12, %s1049_s12  }
   0xb   : > { %s452_s19 = sadd.s32 4294967294, %s727_s17   ;;  %s34_s20 = sadd.s32 1, %s723_s16 }
   0xc   : > { %s43_s21 = sadd.s32 1, %s715_s14  ;;  %p36_p0 = scmp.ge.s32.totalorder %s34_s20, 2 }
   0xd   : > { %p50_p1 = scmp.ne.s32.totalorder %s715_s14, %s711_s13  ;;  %p51_p2 = scmp.eq.s32.totalorder %s727_s17, 0 }
   0xe   : > { %p56_p3 = scmp.ne.s32.totalorder %s711_s13, %s707_s12  ;;  %s1053_s20 = smov (%p36_p0, %s34_s20), 0 }
   0xf   : > { %1028 = sst [smem:[#allocation14_spill]] %s1053_s20  ;;  %p796_p4 = por %p51_p2, %p50_p1 }
  0x10   : > { %p57_p5 = scmp.eq.s32.totalorder %s784_s18, 0  ;;  %s38_s23 = ssub.s32 %s723_s16, %s1053_s20 }
  0x11   : > { %p136_p6 = scmp.eq.s32.totalorder %s784_s18, 1  ;;  %p41_p7 = scmp.eq.s32.totalorder %s38_s23, 0 }
  0x12   : > { %p804_p8 = por %p57_p5, %p56_p3  ;;  %p142_p10 = scmp.eq.s32.totalorder %s452_s19, 1 }
  0x13   : > { %p808_p9 = por %p136_p6, %p50_p1  ;;  %p493_p13 = scmp.lt.s32.totalorder %s727_s17, 2 }
  0x14   : > { %s1030_s24 = scalar_select %p804_p8, 1, 0 }
  0x15   : > { %s1031_s25 = scalar_select %p808_p9, 1, 0 }
  0x16   : > { %s813_s26 = scalar_select %p41_p7, %s715_s14, %s43_s21  }
  0x17   : > { %p815_p11 = por %p142_p10, %p56_p3  ;;  %s162_s28 = sand.u32 1, %s715_s14  }
  0x18   : > { %1032 = sst [smem:[#allocation15_spill]] %s813_s26  ;;  %s824_s29 = sshll.u32 %s162_s28, 3 }
  0x19   : > { %s1033_s27 = scalar_select %p815_p11, 1, 0 }
  0x1a   : > { %s827_s30 = sshll.u32 %s723_s16, 7  ;;  %p831_p0 = pnand %p493_p13, %p796_p4 }
  0x1b   : > { %s181_s5 = sand.u32 1, %s727_s17   ;;  %s1035_s1 = sld [smem:[#allocation16_spill]] }
  0x1c   : > { %s1034_s4 = scalar_select %p831_p0, 1, 0 }
  0x1d   : > { %s185_s9 = scalar_lea.vmem [#allocation6], %s824_s29  ;;  %s847_s11 = scalar_lea.sflag [#allocation7], %s181_s5 }
  0x1e   : > { %s193_s10 = sshll.u32 %s185_s9, 4  ;;  %p853_p4 = pneg %p831_p0  ;;  %s844_s10 = int_to_ptr.vmem [resolvable:$true] %s193_s10 }
  0x21   : > { %s840_s8 = scalar_lea.hbm %s1035_s1, %s827_s30  ;;  %s556_s6 = scalar_lea.hbm %s1035_s1, 256 }
  0x22   : > { %s551_s19 = scalar_lea.hbm %s840_s8, 128  ;;  %p557_p7 = scmp.lt.u32.totalorder %s840_s8, %s1035_s1 }
  0x23   : > { %p552_p3 = scmp.ne.s32.totalorder %s840_s8, %s551_s19  ;;  %p558_p10 = scmp.lt.u32.totalorder %s556_s6, %s551_s19 }
  0x24   : > { %p560_p12 = scmp.lt.u32.totalorder %s551_s19, %s840_s8 }
  0x25   : > { %p554_p5 = pnand %p853_p4, %p552_p3  ;;  %p559_p13 = por %p558_p10, %p557_p7 }
  0x27   : > { %p555_p6 = pneg %p554_p5  ;;  %p561_p1 = por %p560_p12, %p559_p13 }
  0x29   : > { %p562_p2 = pnand %p561_p1, %p555_p6 }
  0x2b   : > { %565 = shalt.err (!%p562_p2)
}
  0x2c   : > { %s566_s5 = scalar_lea.vmem %s844_s10, 128  ;;  %s729_s22 = smov [#allocation6]  }
  0x2d   : > { %p567_p3 = scmp.ne.s32.totalorder %s844_s10, %s566_s5  ;;  %s571_s23 = sshll.u32 %s729_s22, 4  ;;  %s572_s23 = int_to_ptr.vmem [resolvable:$false] %s571_s23 }
  0x2e   : > { %s573_s7 = scalar_lea.vmem %s572_s23, 256  ;;  %p574_p9 = scmp.lt.s32.totalorder %s844_s10, %s572_s23 }
  0x2f   : > { %p569_p5 = pnand %p567_p3, %p853_p4  ;;  %p575_p8 = scmp.lt.s32.totalorder %s573_s7, %s566_s5 }
  0x31   : > { %p570_p11 = pneg %p569_p5  ;;  %p576_p7 = por %p575_p8, %p574_p9 }
  0x33   : > { %p577_p10 = pnand %p576_p7, %p570_p11 }
  0x35   : > { %580 = shalt.err (!%p577_p10)
}
  0x36   : > { %485 = dma.hbm_to_vmem [thread:$0]  (!%p831_p0), %s840_s8, 128, %s844_s10, %s847_s11  }
  0x37   : > { %p1037_p12 = scmp.lt.s32.totalorder %s727_s17, 3  ;;  %p1038_p1 = scmp.ge.s32.totalorder %s727_s17, 1 }
  0x38   : > { %s889_s5 = scalar_lea.hbm %s1017_s0, %s827_s30  ;;  %s166_s22 = scalar_lea.vmem [#allocation3], %s824_s29 }
  0x39   : > { %p881_p2 = pnand %p1038_p1, %p1037_p12  ;;  %s174_s23 = sshll.u32 %s166_s22, 4  ;;  %s892_s23 = int_to_ptr.vmem [resolvable:$true] %s174_s23 }
  0x3a   : > { %s898_s7 = scalar_lea.hbm %s1019_s2, %s827_s30  ;;  %s163_s1 = scalar_lea.sflag [#allocation4], %s162_s28 }
  0x3b   : > { %s1039_s19 = scalar_select %p881_p2, 1, 0 }
  0x3c   : > { %s581_s20 = scalar_lea.hbm %s889_s5, 128  ;;  %s586_s16 = scalar_lea.hbm %s1017_s0, 256 }
  0x3d   : > { %p582_p8 = scmp.ne.s32.totalorder %s889_s5, %s581_s20  ;;  %p587_p6 = scmp.lt.u32.totalorder %s889_s5, %s1017_s0 }
  0x3e   : > { %p588_p13 = scmp.lt.u32.totalorder %s586_s16, %s581_s20  ;;  %p590_p5 = scmp.lt.u32.totalorder %s581_s20, %s889_s5 }
  0x3f   : > { %p584_p9 = pnand %p582_p8, %p853_p4 }
  0x40   : > { %p589_p3 = por %p588_p13, %p587_p6 }
  0x41   : > { %p585_p11 = pneg %p584_p9 }
  0x42   : > { %p591_p7 = por %p590_p5, %p589_p3 }
  0x44   : > { %p592_p10 = pnand %p591_p7, %p585_p11 }
  0x46   : > { %595 = shalt.err (!%p592_p10)
}
  0x47   : > { %s596_s28 = scalar_lea.vmem %s892_s23, 128  ;;  %s730_s30 = smov [#allocation3]  }
  0x48   : > { %p597_p12 = scmp.ne.s32.totalorder %s892_s23, %s596_s28  ;;  %s601_s8 = sshll.u32 %s730_s30, 4  ;;  %s602_s8 = int_to_ptr.vmem [resolvable:$false] %s601_s8 }
  0x49   : > { %s603_s26 = scalar_lea.vmem %s602_s8, 256  ;;  %p604_p9 = scmp.lt.s32.totalorder %s892_s23, %s602_s8 }
  0x4a   : > { %p599_p1 = pnand %p597_p12, %p853_p4  ;;  %p605_p2 = scmp.lt.s32.totalorder %s603_s26, %s596_s28 }
  0x4c   : > { %p600_p8 = pneg %p599_p1  ;;  %p606_p6 = por %p605_p2, %p604_p9 }
  0x4e   : > { %p607_p13 = pnand %p606_p6, %p600_p8 }
  0x50   : > { %610 = shalt.err (!%p607_p13)
}
  0x51   : > { %482 = dma.hbm_to_vmem [thread:$0]  (!%p831_p0), %s889_s5, 128, %s892_s23, %s163_s1  }
  0x52   : > { %s204_s16 = scalar_lea.vmem [#allocation8], %s824_s29  ;;  %s611_s10 = scalar_lea.hbm %s898_s7, 128 }
  0x53   : > { %s212_s20 = sshll.u32 %s204_s16, 4  ;;  %p612_p11 = scmp.ne.s32.totalorder %s898_s7, %s611_s10  ;;  %s213_s20 = int_to_ptr.vmem [resolvable:$true] %s212_s20 }
  0x54   : > { %s616_s22 = scalar_lea.hbm %s1019_s2, 256  ;;  %p617_p5 = scmp.lt.u32.totalorder %s898_s7, %s1019_s2 }
  0x55   : > { %p614_p2 = pnand %p612_p11, %p853_p4  ;;  %p618_p7 = scmp.lt.u32.totalorder %s616_s22, %s611_s10 }
  0x56   : > { %p620_p12 = scmp.lt.u32.totalorder %s611_s10, %s898_s7 }
  0x57   : > { %p615_p3 = pneg %p614_p2  ;;  %p619_p10 = por %p618_p7, %p617_p5 }
  0x59   : > { %p621_p1 = por %p620_p12, %p619_p10 }
  0x5b   : > { %p622_p8 = pnand %p621_p1, %p615_p3 }
  0x5d   : > { %625 = shalt.err (!%p622_p8)
}
  0x5e   : > { %s626_s1 = scalar_lea.vmem %s213_s20, 128  ;;  %s731_s29 = smov [#allocation8]  }
  0x5f   : > { %p627_p9 = scmp.ne.s32.totalorder %s213_s20, %s626_s1  ;;  %s631_s5 = sshll.u32 %s731_s29, 4  ;;  %s632_s5 = int_to_ptr.vmem [resolvable:$false] %s631_s5 }
  0x60   : > { %s633_s23 = scalar_lea.vmem %s632_s5, 256  ;;  %p634_p11 = scmp.lt.s32.totalorder %s213_s20, %s632_s5 }
  0x61   : > { %p629_p6 = pnand %p627_p9, %p853_p4  ;;  %p635_p2 = scmp.lt.s32.totalorder %s633_s23, %s626_s1 }
  0x63   : > { %p630_p13 = pneg %p629_p6  ;;  %p636_p0 = por %p635_p2, %p634_p11 }
  0x65   : > { %p637_p5 = pnand %p636_p0, %p630_p13 }
  0x67   : > { %640 = shalt.err (!%p637_p5)
}
  0x68   : > { %p1040_p7 = scmp.ne.s32.totalorder %s1034_s4, 0  ;;  %p1041_p3 = scmp.ne.s32.totalorder %s1039_s19, 0 }
  0x69   : > { %s945_s21 = sand.u32 (!%p1041_p3), 1, %s711_s13   ;;  %p1042_p0 = scmp.ne.s32.totalorder (!%p1041_p3), %s1030_s24, 0 }
  0x6a   : > { %488 = dma.hbm_to_vmem [thread:$0]  (!%p1040_p7), %s898_s7, 128, %s213_s20, %s847_s11  }
  0x6b   : > { %221 = sbr.rel (%p1041_p3) target bundleno = 182 (0xb6), region = 32  ;;  %s948_s8 = sshll.u32 (!%p1041_p3), %s945_s21, 3 }
  0x6c   : > { %s224_s26 = scalar_lea.sflag (!%p1041_p3), [#allocation4], %s945_s21  ;;  %s227_s16 = scalar_lea.vmem (!%p1041_p3), [#allocation3], %s948_s8 }
  0x72   : > { %694 = dma.done.wait (%p1042_p0), %s224_s26, 128  }
  0x73   : > { %696 = vsyncadd (%p1042_p0), %s224_s26, 4294967168  ;;  %s232_s4 = sand.u32 1, %s784_s18   ;;  %s236_s19 = scalar_lea.vmem [#allocation6], %s948_s8 }
  0x74   : > { %s233_s11 = scalar_lea.sflag [#allocation7], %s232_s4 }
  0x75   : > { %698 = dma.done.wait (%p1042_p0), %s233_s11, 256  }
  0x76   : > { %700 = vsyncadd (%p1042_p0), %s233_s11, 4294967040  ;;  %v283_v0 = vld [vmem:[%s227_s16] sm:$0xff]  ;;  %v284_v8 = vld [vmem:[%s236_s19] sm:$0xff]  ;;  %s245_s18 = scalar_lea.vmem [#allocation8], %s948_s8  ;;  %s277_s24 = scalar_lea.vmem [#allocation9], %s948_s8 }
  0x77   : > { %v466_v1 = vmul.f32 -1.442695, %v283_v0  ;;  %v296_v11 = vsub.f32 1.0, %v284_v8  ;;  %v285_v16 = vld [vmem:[%s245_s18] sm:$0xff]  ;;  %s327_s7 = sshll.u32 %s277_s24, 4  ;;  %s468_s20 = sshll.u32 %s719_s15, 7  ;;  %s965_s7 = int_to_ptr.vmem [resolvable:$true] %s327_s7 }
  0x78   : > { %s970_s9 = scalar_lea.hbm %s1020_s3, %s468_s20  ;;  %s314_s22 = scalar_lea.sflag [#allocation5], %s945_s21 }
  0x79   : > { %543 = vpow2.f32 %v466_v1  ;;  %s641_s28 = scalar_lea.vmem %s965_s7, 128  ;;  %p1043_p10 = scmp.ne.s32.totalorder %s1031_s25, 0 }
  0x7a   : > { %p642_p4 = scmp.ne.s32.totalorder %s965_s7, %s641_s28  ;;  %s732_s15 = smov [#allocation9]  }
  0x7b   : > { %s645_s30 = sshll.u32 %s732_s15, 4  ;;  %s646_s30 = int_to_ptr.vmem [resolvable:$false] %s645_s30 }
  0x7c   : > { %p643_p12 = pnand %p642_p4, %p1043_p10  ;;  %s647_s1 = scalar_lea.vmem %s646_s30, 256 }
  0x7d   : > { %p648_p8 = scmp.lt.s32.totalorder %s965_s7, %s646_s30  ;;  %p649_p9 = scmp.lt.s32.totalorder %s647_s1, %s641_s28 }
  0x7e   : > { %p644_p1 = pneg %p643_p12 }
  0x7f   : > { %p650_p6 = por %p649_p9, %p648_p8 }
  0x81   : > { %p651_p13 = pnand %p650_p6, %p644_p1 }
  0x83   : > { %v544_v2 = vpop.eup %543 }
  0x84   : > { %v289_v3 = vadd.f32 1.0, %v544_v2 }
  0x86   : > { %545 = vrcp.f32 %v289_v3 }
  0x90   : > { %v546_v4 = vpop.eup %545 }
  0x91   : > { %v292_v5 = vadd.f32 1e-05, %v546_v4  ;;  %v297_v6 = vsub.f32 1.0, %v546_v4 }
  0x93   : > { %547 = vlog2.f32 %v292_v5  ;;  %v298_v7 = vadd.f32 1e-05, %v297_v6 }
  0x95   : > { %549 = vlog2.f32 %v298_v7 }
  0x9d   : > { %v548_v9 = vpop.eup %547 }
  0x9e   : > { %v294_v10 = vmul.f32 0.6931472, %v548_v9 }
  0x9f   : > { %v550_v12 = vpop.eup %549 }
  0xa0   : > { %v295_v13 = vmul.f32 %v294_v10, %v284_v8  ;;  %v300_v14 = vmul.f32 0.6931472, %v550_v12 }
  0xa2   : > { %v301_v15 = vmul.f32 %v300_v14, %v296_v11 }
  0xa4   : > { %v302_v17 = vadd.f32 %v301_v15, %v295_v13 }
  0xa6   : > { %v303_v18 = vmul.f32 %v302_v17, %v285_v16 }
  0xa8   : > { %312 = vst [vmem:[%s277_s24] sm:$0xff] %v303_v18 }
  0xa9   : > { %654 = shalt.err (!%p651_p13)
}
  0xaa   : > { %s655_s29 = scalar_lea.hbm %s970_s9, 128  ;;  %s659_s21 = scalar_lea.hbm %s1020_s3, 256 }
  0xab   : > { %p656_p11 = scmp.ne.s32.totalorder %s970_s9, %s655_s29  ;;  %p660_p7 = scmp.lt.u32.totalorder %s970_s9, %s1020_s3 }
  0xac   : > { %p661_p3 = scmp.lt.u32.totalorder %s659_s21, %s655_s29  ;;  %p663_p4 = scmp.lt.u32.totalorder %s655_s29, %s970_s9 }
  0xad   : > { %p657_p2 = pnand %p656_p11, %p1043_p10 }
  0xae   : > { %p662_p0 = por %p661_p3, %p660_p7 }
  0xaf   : > { %p658_p5 = pneg %p657_p2 }
  0xb0   : > { %p664_p12 = por %p663_p4, %p662_p0 }
  0xb2   : > { %p665_p1 = pnand %p664_p12, %p658_p5 }
  0xb4   : > { %668 = shalt.err (!%p665_p1)
}
  0xb5   : > { %477 = dma.vmem_to_hbm [thread:$0]  (%p1043_p10), %s965_s7, 128, %s970_s9, %s314_s22  }
  0xb6 PF: > { %s339_s16 = sand.u32 1, %s707_s12   ;;  %p1044_p8 = scmp.ne.s32.totalorder %s1033_s27, 0 }
  0xb7   : > { %p1045_p9 = scmp.ge.s32.totalorder %s727_s17, 2  ;;  %s340_s4 = scalar_lea.sflag [#allocation5], %s339_s16 }
  0xb9   : > { %p490_p6 = pnand %p1045_p9, %p1044_p8 }
  0xbb   : > { %702 = dma.done.wait (!%p490_p6), %s340_s4, 128  }
  0xbc   : > { %704 = vsyncadd (!%p490_p6), %s340_s4, 4294967168  ;;  %s22_s17 = sadd.s32 1, %s727_s17   ;;  %s1046_s25 = sld [smem:[#allocation15_spill]] }
  0xbd   : > { %p19_p13 = scmp.ge.s32.totalorder %s22_s17, 4   ;;  %s1047_s15 = sld [smem:[#allocation13_spill]] }
  0xbe   : > { %s1048_s16 = sld [smem:[#allocation14_spill]]  ;;  %s1049_s12 = smov %s711_s13 }
  0xbf   : > { %s1050_s13 = smov %s715_s14  ;;  %21 = sbr.rel (!%p19_p13) target bundleno = 10 (0xa), region = 109 }
  0xc2   : > { %s1051_s14 = smov %s1046_s25 }
  0xc6   :  { %345 = vsyncpa [#allocation4], 1 }
  0xc7   :  { %347 = vsyncpa [#allocation4 + $0x1], 1 }
  0xc8   :  { %348 = vsyncpa [#allocation7], 1 }
  0xc9   :  { %350 = vsyncpa [#allocation7 + $0x1], 1 }
  0xca   :  { %351 = vsyncpa [#allocation5], 1 }
  0xcb   :  { %353 = vsyncpa [#allocation5 + $0x1], 1 }

</bundles_post_ra>
